<compile_context>
chip_gen: v6e
topology: v6e:2x2x1
jax: 0.10.0
libtpu: 0.0.40
codegen_flags: <defaults>
</compile_context>

<pallas_src>
import functools
import math

import jax
import jax.numpy as jnp
from jax.experimental import pallas as pl
from jax.experimental.pallas import tpu as pltpu


# --------------------------------------------------------------------------- #
# helpers
# --------------------------------------------------------------------------- #
def _round_up(x, m):
    return ((x + m - 1) // m) * m


def _vmem_cap_bytes():
    """85% of physical VMEM (leave headroom for Mosaic internal scratch)."""
    try:
        cap = int(pltpu.get_tpu_info().vmem_capacity_bytes)
    except Exception:
        cap = 64 << 20          # conservative (v7x per-TC physical size)
    return int(cap * 0.85)


def _plan(n):
    """Return (Np, tm, fused) for the GCN stage."""
    np0 = _round_up(max(n, 1), 128)
    if np0 <= 2048:             # adj <= 8 MiB bf16 -> keep fully VMEM resident
        return np0, np0, True
    # striped fallback: adj row stripe (tm, Np) bf16 kept around ~8 MiB
    tm = max(128, min(1024, ((8 << 20) // (np0 * 2)) // 128 * 128))
    np_ = _round_up(n, tm)
    return np_, tm, False


# --------------------------------------------------------------------------- #
# Kernel 1a (fused): weighted_x = ( GCN2( GCN1(x) ) ) * sto_weight
#   adj, x, weights all VMEM resident; adj read from HBM exactly once.
# --------------------------------------------------------------------------- #
def _gcn2_fused_kernel(adj_ref, x_ref, w0_ref, b0_ref, w1_ref, b1_ref,
                       wgt_ref, out_ref):
    f32, bf16 = jnp.float32, jnp.bfloat16
    adj = adj_ref[...]                                           # (Np, Np) bf16

    # layer 0: h0 = relu((adj @ x) @ W0 + b0)
    ax = jnp.dot(adj, x_ref[...], preferred_element_type=f32)
    h0 = jnp.dot(ax.astype(bf16), w0_ref[...],
                 preferred_element_type=f32) + b0_ref[...]
    h0 = jnp.maximum(h0, 0.0)

    # layer 1: h1 = (adj @ h0) @ W1 + b1
    ah = jnp.dot(adj, h0.astype(bf16), preferred_element_type=f32)
    h1 = jnp.dot(ah.astype(bf16), w1_ref[...],
                 preferred_element_type=f32) + b1_ref[...]

    # fused sto_weight scaling -> weighted_x
    out_ref[...] = (h1 * wgt_ref[...]).astype(out_ref.dtype)


def _gcn2_fused_call(adj_p, x_p, wgt_p, pp, vmem_cap):
    np_ = adj_p.shape[0]
    hp = pp["w1"].shape[1]
    vmem = pl.BlockSpec(memory_space=pltpu.MemorySpace.VMEM)
    return pl.pallas_call(
        _gcn2_fused_kernel,
        out_shape=jax.ShapeDtypeStruct((np_, hp), jnp.bfloat16),
        in_specs=[vmem] * 7,
        out_specs=vmem,
        compiler_params=pltpu.CompilerParams(vmem_limit_bytes=vmem_cap),
    )(adj_p, x_p, pp["w0"], pp["b0"], pp["w1"], pp["b1"], wgt_p)


# --------------------------------------------------------------------------- #
# Kernel 1b (striped fallback, large Np): one GCN layer, grid over row tiles.
#   No k axis, no accumulator scratch; feat is fully VMEM resident.
# --------------------------------------------------------------------------- #
def _gcn_layer_kernel(adj_ref, feat_ref, w_ref, b_ref, wgt_ref, out_ref, *,
                      relu, scale):
    f32, bf16 = jnp.float32, jnp.bfloat16
    h = jnp.dot(adj_ref[...], feat_ref[...], preferred_element_type=f32)
    h = jnp.dot(h.astype(bf16), w_ref[...],
                preferred_element_type=f32) + b_ref[...]
    if relu:
        h = jnp.maximum(h, 0.0)
    if scale:
        h = h * wgt_ref[...]
    out_ref[...] = h.astype(out_ref.dtype)


def _gcn_layer_call(adj, feat, w, b, wgt, *, relu, scale, tm, vmem_cap):
    np_ = adj.shape[0]
    fi = feat.shape[1]
    fo = w.shape[1]
    kernel = functools.partial(_gcn_layer_kernel, relu=relu, scale=scale)
    return pl.pallas_call(
        kernel,
        out_shape=jax.ShapeDtypeStruct((np_, fo), jnp.bfloat16),
        grid_spec=pltpu.PrefetchScalarGridSpec(
            num_scalar_prefetch=0,
            grid=(np_ // tm,),
            in_specs=[
                pl.BlockSpec((tm, np_), lambda i: (i, 0)),   # adj row-stripe
                pl.BlockSpec((np_, fi), lambda i: (0, 0)),   # feat resident
                pl.BlockSpec((fi, fo), lambda i: (0, 0)),    # weight
                pl.BlockSpec((1, fo), lambda i: (0, 0)),     # bias
                pl.BlockSpec((tm, 1), lambda i: (i, 0)),     # sto_weight tile
            ],
            out_specs=pl.BlockSpec((tm, fo), lambda i: (i, 0))),
        compiler_params=pltpu.CompilerParams(
            dimension_semantics=("parallel",),
            vmem_limit_bytes=vmem_cap),
    )(adj, feat, w, b, wgt)


# --------------------------------------------------------------------------- #
# Kernel 2: scatter_sum + Set2Set (2 steps) + mean_lin + normalize.
#   Gridded over graph-batch tiles; weighted_x and weights stay resident.
# --------------------------------------------------------------------------- #
def _sto_pool_kernel(wx_ref, seg_ref, wq_ref, wr_ref, wh_ref, bg_ref,
                     lwq_ref, lwr_ref, lb_ref, out_ref):
    f32, bf16 = jnp.float32, jnp.bfloat16

    wx_b = wx_ref[...]                                # (Np, Hp) bf16 weighted_x
    seg = seg_ref[...]                                # (bt, Np) bf16 one-hot
    inseg = seg > 0
    wx_t = wx_b.T                                     # transpose ONCE (Hp, Np)

    # sto = scatter_sum(weighted_x, sto_batch) == seg @ weighted_x
    sto = jnp.dot(seg, wx_b, preferred_element_type=f32)        # (bt, Hp)

    bt = seg.shape[0]
    hp = wx_b.shape[1]

    # Set2Set (1-layer LSTM, zero init): the LSTM output q equals the hidden
    # state h, so h_b carries both; r is the attention readout.
    h_b = jnp.zeros((bt, hp), bf16)
    r_b = jnp.zeros((bt, hp), bf16)
    c_f = jnp.zeros((bt, hp), f32)

    for _ in range(2):                                # num_step_set2set
        # single matmul per LSTM input produces all 4 gates (i, f, g, o)
        gates = (jnp.dot(h_b, wq_ref[...], preferred_element_type=f32)   # q
                 + jnp.dot(r_b, wr_ref[...], preferred_element_type=f32) # r
                 + jnp.dot(h_b, wh_ref[...], preferred_element_type=f32) # hid
                 + bg_ref[...])                                  # (bt, 4*Hp)
        i_g = jax.nn.sigmoid(gates[:, 0 * hp:1 * hp])
        f_g = jax.nn.sigmoid(gates[:, 1 * hp:2 * hp])
        g_g = jnp.tanh(gates[:, 2 * hp:3 * hp])
        o_g = jax.nn.sigmoid(gates[:, 3 * hp:4 * hp])
        c_f = f_g * c_f + i_g * g_g
        h_f = o_g * jnp.tanh(c_f)
        h_b = h_f.astype(bf16)                        # q = LSTM output

        # segment softmax attention in (B, N) layout
        e = jnp.dot(h_b, wx_t, preferred_element_type=f32)       # (bt, Np)
        masked = jnp.where(inseg, e, -1e30)
        seg_max = jnp.max(masked, axis=1, keepdims=True)
        p = jnp.where(inseg, jnp.exp(jnp.minimum(e - seg_max, 0.0)), 0.0)
        denom = jnp.sum(p, axis=1, keepdims=True) + 1e-16
        alpha = p * (1.0 / denom)                     # exact division
        r_f = jnp.dot(alpha.astype(bf16), wx_b, preferred_element_type=f32)
        r_b = r_f.astype(bf16)

    # mean = mean_lin([q, r]) + sto ; F.normalize(dim=1)
    mean = (jnp.dot(h_b, lwq_ref[...], preferred_element_type=f32)
            + jnp.dot(r_b, lwr_ref[...], preferred_element_type=f32)
            + lb_ref[...] + sto)
    ss = jnp.sum(mean * mean, axis=1, keepdims=True)
    out_ref[...] = mean * jax.lax.rsqrt(jnp.maximum(ss, 1e-24))


def _sto_pool_call(wx, seg_p, pp, bt, vmem_cap):
    bp, np_ = seg_p.shape
    hp = wx.shape[1]
    return pl.pallas_call(
        _sto_pool_kernel,
        out_shape=jax.ShapeDtypeStruct((bp, hp), jnp.float32),
        grid_spec=pltpu.PrefetchScalarGridSpec(
            num_scalar_prefetch=0,
            grid=(bp // bt,),
            in_specs=[
                pl.BlockSpec((np_, hp), lambda i: (0, 0)),       # weighted_x
                pl.BlockSpec((bt, np_), lambda i: (i, 0)),       # seg B-tile
                pl.BlockSpec(pp["wq"].shape, lambda i: (0, 0)),
                pl.BlockSpec(pp["wr"].shape, lambda i: (0, 0)),
                pl.BlockSpec(pp["wh"].shape, lambda i: (0, 0)),
                pl.BlockSpec(pp["bg"].shape, lambda i: (0, 0)),
                pl.BlockSpec(pp["lwq"].shape, lambda i: (0, 0)),
                pl.BlockSpec(pp["lwr"].shape, lambda i: (0, 0)),
                pl.BlockSpec(pp["lb"].shape, lambda i: (0, 0)),
            ],
            out_specs=pl.BlockSpec((bt, hp), lambda i: (i, 0))),
        compiler_params=pltpu.CompilerParams(
            dimension_semantics=("parallel",),
            vmem_limit_bytes=vmem_cap),
    )(wx, seg_p, pp["wq"], pp["wr"], pp["wh"], pp["bg"],
      pp["lwq"], pp["lwr"], pp["lb"])


# --------------------------------------------------------------------------- #
# Parameter packing: pad to lane-dense shapes, concat LSTM gates along lanes
# --------------------------------------------------------------------------- #
def _pad2(a, rows, cols):
    out = jnp.zeros((rows, cols), a.dtype)
    return out.at[:a.shape[0], :a.shape[1]].set(a)


def prepare_params(p, hidden_dim, input_dim):
    H = hidden_dim
    Hp = _round_up(H, 128)
    Fp = _round_up(input_dim, 128)
    bf = jnp.bfloat16
    wih, whh, b = p["lstm_wih"], p["lstm_whh"], p["lstm_b"]

    def pack_gates(w):        # w: (H_in, 4H) -> (Hp, 4*Hp), gate g at lanes g*Hp+
        return jnp.concatenate(
            [_pad2(w[:, g * H:(g + 1) * H], Hp, Hp) for g in range(4)],
            axis=1).astype(bf)

    wq = pack_gates(wih[:H])            # q (first half of q_star) input weights
    wr = pack_gates(wih[H:2 * H])       # r (second half of q_star) input weights
    wh = pack_gates(whh)                # recurrent weights
    bg = jnp.concatenate(
        [_pad2(b[g * H:(g + 1) * H][None, :], 1, Hp) for g in range(4)],
        axis=1)                         # (1, 4*Hp) f32

    return {
        "w0": _pad2(p["gcn_w0"], Fp, Hp).astype(bf),
        "b0": _pad2(p["gcn_b0"][None, :], 1, Hp),
        "w1": _pad2(p["gcn_w1"], Hp, Hp).astype(bf),
        "b1": _pad2(p["gcn_b1"][None, :], 1, Hp),
        "wq": wq, "wr": wr, "wh": wh, "bg": bg,
        "lwq": _pad2(p["lin_w"][:H], Hp, Hp).astype(bf),
        "lwr": _pad2(p["lin_w"][H:2 * H], Hp, Hp).astype(bf),
        "lb": _pad2(p["lin_b"][None, :], 1, Hp),
    }, Hp, Fp


# --------------------------------------------------------------------------- #
# Graph glue: dense sym-normalized adjacency, built directly at padded size
# --------------------------------------------------------------------------- #
def build_norm_adj_padded(src, dst, n, n_pad):
    a = jnp.zeros((n_pad, n_pad), jnp.float32)
    a = a.at[src, dst].set(1.0)
    diag = jnp.arange(n)
    a = a.at[diag, diag].set(1.0)                     # self loops (real nodes)
    deg = a.sum(axis=1)
    dinv = jnp.where(deg > 0, jax.lax.rsqrt(jnp.maximum(deg, 1e-12)), 0.0)
    return (a * dinv[:, None] * dinv[None, :]).astype(jnp.bfloat16)


# --------------------------------------------------------------------------- #
# Forward wrapper
# --------------------------------------------------------------------------- #
def sto_enc_forward(sto_x, sto_edge_index, sto_weight, sto_batch, num_graphs,
                    params):
    # x = weight[data.sto_x - 1]  (embedding gather; JAX glue)
    x_emb = params["elem_table"][sto_x - 1]
    N, Din = x_emb.shape
    H = params["gcn_w1"].shape[1]

    pp, Hp, Fp = prepare_params(params, H, Din)
    Np, tm, fused = _plan(N)
    cap = _vmem_cap_bytes()

    bf = jnp.bfloat16
    adj_p = build_norm_adj_padded(sto_edge_index[0], sto_edge_index[1], N, Np)
    x_p = jnp.zeros((Np, Fp), bf).at[:N, :Din].set(x_emb.astype(bf))
    wgt_p = jnp.zeros((Np, 1), jnp.float32).at[:N, :].set(
        sto_weight.reshape(-1, 1).astype(jnp.float32))

    bt = min(64, _round_up(num_graphs, 8))
    Bp = _round_up(num_graphs, bt)
    seg = (sto_batch[None, :] == jnp.arange(num_graphs)[:, None])
    seg_p = jnp.zeros((Bp, Np), bf).at[:num_graphs, :N].set(seg.astype(bf))

    if fused:
        # adj read once; weighted_x produced directly
        wx = _gcn2_fused_call(adj_p, x_p, wgt_p, pp, cap)
    else:
        h0 = _gcn_layer_call(adj_p, x_p, pp["w0"], pp["b0"], wgt_p,
                             relu=True, scale=False, tm=tm, vmem_cap=cap)
        wx = _gcn_layer_call(adj_p, h0, pp["w1"], pp["b1"], wgt_p,
                             relu=False, scale=True, tm=tm, vmem_cap=cap)

    out_p = _sto_pool_call(wx, seg_p, pp, bt, cap)
    return out_p[:num_graphs, :H]


# --------------------------------------------------------------------------- #
# Parameter init (matches the module's init_model: xavier linear, zero bias)
# --------------------------------------------------------------------------- #
def xavier_uniform(key, shape):
    bound = math.sqrt(6.0 / (shape[0] + shape[1]))
    return jax.random.uniform(key, shape, jnp.float32, -bound, bound)


def init_params(key, input_dim, hidden_dim):
    H = hidden_dim
    ks = jax.random.split(key, 8)
    lstm_bound = 1.0 / math.sqrt(H)
    return {
        "gcn_w0": xavier_uniform(ks[0], (input_dim, H)),
        "gcn_b0": jnp.zeros((H,), jnp.float32),
        "gcn_w1": xavier_uniform(ks[1], (H, H)),
        "gcn_b1": jnp.zeros((H,), jnp.float32),
        # LSTM: input is q_star (2H) -> 4H gates (i, f, g, o); single bias
        # (a PyTorch port must pass b_ih + b_hh here).
        "lstm_wih": jax.random.uniform(ks[2], (2 * H, 4 * H), jnp.float32,
                                       -lstm_bound, lstm_bound),
        "lstm_whh": jax.random.uniform(ks[3], (H, 4 * H), jnp.float32,
                                       -lstm_bound, lstm_bound),
        "lstm_b": jax.random.uniform(ks[4], (4 * H,), jnp.float32,
                                     -lstm_bound, lstm_bound),
        # mean_lin: Linear(2H -> H), xavier weight, zero bias
        "lin_w": xavier_uniform(ks[5], (2 * H, H)),
        "lin_b": jnp.zeros((H,), jnp.float32),
        # element embedding table passed as `weight` to forward()
        "elem_table": 0.1 * jax.random.normal(ks[6], (16, input_dim),
                                              jnp.float32),
    }


if __name__ == "__main__":
    key = jax.random.PRNGKey(0)
    B, nodes_per_graph = 2, 4
    N = B * nodes_per_graph
    num_elements, input_dim, hidden_dim = 16, 16, 32

    k_data, k_par = jax.random.split(key)
    kd = jax.random.split(k_data, 4)

    # synthetic "data" object fields
    sto_x = jax.random.randint(kd[0], (N,), 1, num_elements + 1)     # 1-based
    sto_batch = jnp.repeat(jnp.arange(B, dtype=jnp.int32), nodes_per_graph)
    sto_weight = jax.random.uniform(kd[1], (N, 1), jnp.float32, 0.1, 1.0)
    # ring edges inside each graph (undirected)
    src, dst = [], []
    for g in range(B):
        base = g * nodes_per_graph
        for i in range(nodes_per_graph):
            a, b = base + i, base + (i + 1) % nodes_per_graph
            src += [a, b]
            dst += [b, a]
    sto_edge_index = jnp.stack([jnp.array(src, jnp.int32),
                                jnp.array(dst, jnp.int32)])

    params = init_params(k_par, input_dim, hidden_dim)

    out = sto_enc_forward(sto_x, sto_edge_index, sto_weight, sto_batch, B,
                          params)
    out = jax.block_until_ready(out)

    assert out.shape == (B, hidden_dim)
    assert bool(jnp.all(jnp.isfinite(out)))
    # rows are L2-normalized
    assert bool(jnp.allclose(jnp.linalg.norm(out, axis=1), 1.0, atol=1e-3))
    print("KERNEL_OK")
</pallas_src>

<mosaic_0001>
module attributes {stable_mosaic.version = 11 : i64} {
  func.func @_gcn2_fused_kernel(%arg0: memref<128x128xbf16, #tpu.memory_space<vmem>>, %arg1: memref<128x128xbf16, #tpu.memory_space<vmem>>, %arg2: memref<128x128xbf16, #tpu.memory_space<vmem>>, %arg3: memref<1x128xf32, #tpu.memory_space<vmem>>, %arg4: memref<128x128xbf16, #tpu.memory_space<vmem>>, %arg5: memref<1x128xf32, #tpu.memory_space<vmem>>, %arg6: memref<128x1xf32, #tpu.memory_space<vmem>>, %arg7: memref<128x128xbf16, #tpu.memory_space<vmem>>) attributes {dimension_semantics = [], scalar_prefetch = 0 : i64, scratch_operands = 0 : i64, tpu.core_type = #tpu.core_type<tc>} {
    %c0 = arith.constant 0 : index
    %c0_0 = arith.constant 0 : index
    %0 = vector.load %arg0[%c0, %c0_0] : memref<128x128xbf16, #tpu.memory_space<vmem>>, vector<128x128xbf16>
    %c0_1 = arith.constant 0 : index
    %c0_2 = arith.constant 0 : index
    %1 = vector.load %arg1[%c0_1, %c0_2] : memref<128x128xbf16, #tpu.memory_space<vmem>>, vector<128x128xbf16>
    %cst = arith.constant dense<0.000000e+00> : vector<128x128xf32>
    %2 = tpu.matmul %0, %1, %cst {dimension_numbers = #tpu.dot_dimension_numbers<[1], [0], [0], [1], [0, 0, 1, 1], [], []>} : vector<128x128xbf16>, vector<128x128xbf16>, vector<128x128xf32> -> vector<128x128xf32>
    %3 = arith.truncf %2 : vector<128x128xf32> to vector<128x128xbf16>
    %c0_3 = arith.constant 0 : index
    %c0_4 = arith.constant 0 : index
    %4 = vector.load %arg2[%c0_3, %c0_4] : memref<128x128xbf16, #tpu.memory_space<vmem>>, vector<128x128xbf16>
    %cst_5 = arith.constant dense<0.000000e+00> : vector<128x128xf32>
    %5 = tpu.matmul %3, %4, %cst_5 {dimension_numbers = #tpu.dot_dimension_numbers<[1], [0], [0], [1], [0, 0, 1, 1], [], []>} : vector<128x128xbf16>, vector<128x128xbf16>, vector<128x128xf32> -> vector<128x128xf32>
    %c0_6 = arith.constant 0 : index
    %c0_7 = arith.constant 0 : index
    %6 = vector.load %arg3[%c0_6, %c0_7] : memref<1x128xf32, #tpu.memory_space<vmem>>, vector<1x128xf32>
    %7 = vector.broadcast %6 : vector<1x128xf32> to vector<128x128xf32>
    %8 = arith.addf %5, %7 : vector<128x128xf32>
    %cst_8 = arith.constant 0.000000e+00 : f32
    %9 = vector.broadcast %cst_8 : f32 to vector<128x128xf32>
    %10 = arith.maximumf %8, %9 : vector<128x128xf32>
    %11 = arith.truncf %10 : vector<128x128xf32> to vector<128x128xbf16>
    %cst_9 = arith.constant dense<0.000000e+00> : vector<128x128xf32>
    %12 = tpu.matmul %0, %11, %cst_9 {dimension_numbers = #tpu.dot_dimension_numbers<[1], [0], [0], [1], [0, 0, 1, 1], [], []>} : vector<128x128xbf16>, vector<128x128xbf16>, vector<128x128xf32> -> vector<128x128xf32>
    %13 = arith.truncf %12 : vector<128x128xf32> to vector<128x128xbf16>
    %c0_10 = arith.constant 0 : index
    %c0_11 = arith.constant 0 : index
    %14 = vector.load %arg4[%c0_10, %c0_11] : memref<128x128xbf16, #tpu.memory_space<vmem>>, vector<128x128xbf16>
    %cst_12 = arith.constant dense<0.000000e+00> : vector<128x128xf32>
    %15 = tpu.matmul %13, %14, %cst_12 {dimension_numbers = #tpu.dot_dimension_numbers<[1], [0], [0], [1], [0, 0, 1, 1], [], []>} : vector<128x128xbf16>, vector<128x128xbf16>, vector<128x128xf32> -> vector<128x128xf32>
    %c0_13 = arith.constant 0 : index
    %c0_14 = arith.constant 0 : index
    %16 = vector.load %arg5[%c0_13, %c0_14] : memref<1x128xf32, #tpu.memory_space<vmem>>, vector<1x128xf32>
    %17 = vector.broadcast %16 : vector<1x128xf32> to vector<128x128xf32>
    %18 = arith.addf %15, %17 : vector<128x128xf32>
    %c0_15 = arith.constant 0 : index
    %c0_16 = arith.constant 0 : index
    %19 = vector.load %arg6[%c0_15, %c0_16] : memref<128x1xf32, #tpu.memory_space<vmem>>, vector<128x1xf32>
    %20 = vector.broadcast %19 : vector<128x1xf32> to vector<128x128xf32>
    %21 = arith.mulf %18, %20 : vector<128x128xf32>
    %22 = arith.truncf %21 : vector<128x128xf32> to vector<128x128xbf16>
    %c0_17 = arith.constant 0 : index
    %c0_18 = arith.constant 0 : index
    %23 = vector.load %arg7[%c0_17, %c0_18] : memref<128x128xbf16, #tpu.memory_space<vmem>>, vector<128x128xbf16>
    tpu.vector_store %arg7[%c0_17, %c0_18], %22 {strides = array<i32>} : memref<128x128xbf16, #tpu.memory_space<vmem>>, vector<128x128xbf16>,
    return
  }
}

</mosaic_0001>

<bundles_post_ra>
// kernel: tpu_custom_call.1
= control target key start
LH: loop header
LB: loop body
LE: loop exit
PB: predicated region body
PF: predicated region fallthrough
CT: control target
= control target key end

     0   :  { %12 = vsyncpa [#allocation3], 0  ;;  %s1587_s0 = inlined_call_operand.vmem [shape: bf16[128,128], index: 0, kind: input, shape index: {}]   ;;  %s1588_s1 = inlined_call_operand.vmem [shape: bf16[128,128], index: 1, kind: input, shape index: {}]   ;;  %s1589_s2 = inlined_call_operand.hbm [shape: bf16[128,128], index: 2, kind: input, shape index: {}]   ;;  %s1590_s3 = inlined_call_operand.vmem [shape: f32[1,128], index: 3, kind: input, shape index: {}]   ;;  %s1591_s4 = inlined_call_operand.hbm [shape: bf16[128,128], index: 4, kind: input, shape index: {}]   ;;  %s1592_s5 = inlined_call_operand.vmem [shape: f32[1,128], index: 5, kind: input, shape index: {}]   ;;  %s1593_s6 = inlined_call_operand.vmem [shape: f32[128,1], index: 6, kind: input, shape index: {}]   ;;  %s1594_s7 = inlined_call_operand.hbm [shape: bf16[128,128], index: 7, kind: output, shape index: {}]  }
   0x1   :  { %13 = vsyncpa [#allocation6], 0 }
   0x2   :  { %14 = vsyncpa [#allocation4], 0  ;;  %s1375_s24 = smov [#allocation2]  }
   0x3   :  { %s24_s25 = sshll.u32 %s1375_s24, 4  ;;  %s25_s25 = int_to_ptr.vmem [resolvable:$true] %s24_s25 }
   0x4   :  { %s1317_s26 = scalar_lea.vmem %s25_s25, 1024  ;;  %p1322_p1 = scmp.lt.s32.totalorder %s25_s25, %s25_s25 }
   0x5   :  { %p1318_p0 = scmp.ne.s32.totalorder %s25_s25, %s1317_s26  ;;  %p1323_p2 = scmp.lt.s32.totalorder %s1317_s26, %s1317_s26 }
   0x7   :  { %p1324_p3 = por %p1323_p2, %p1322_p1 }
   0x9   :  { %p1325_p4 = pnand %p1324_p3, %p1318_p0 }
   0xb   :  { %1328 = shalt.err (!%p1325_p4)
}
   0xc   :  { %s1376_s27 = smov 64   ;;  %s1377_s28 = smov 4  }
   0xd   :  { %30 = dma.hbm_to_vmem [thread:$0]  %s1589_s2, 1024, %s25_s25, [#allocation3], %s1376_s27, %s1376_s27, %s1377_s28  }
   0xe   :  { %s1378_s8 = smov [#allocation5]  }
   0xf   :  { %s38_s9 = sshll.u32 %s1378_s8, 4  ;;  %s39_s9 = int_to_ptr.vmem [resolvable:$true] %s38_s9 }
  0x10   :  { %s1337_s10 = scalar_lea.vmem %s39_s9, 1024  ;;  %p1342_p6 = scmp.lt.s32.totalorder %s39_s9, %s39_s9 }
  0x11   :  { %p1338_p5 = scmp.ne.s32.totalorder %s39_s9, %s1337_s10  ;;  %p1343_p7 = scmp.lt.s32.totalorder %s1337_s10, %s1337_s10 }
  0x13   :  { %p1344_p8 = por %p1343_p7, %p1342_p6 }
  0x15   :  { %p1345_p9 = pnand %p1344_p8, %p1338_p5 }
  0x17   :  { %1348 = shalt.err (!%p1345_p9)
}
  0x18   :  { %44 = dma.hbm_to_vmem [thread:$0]  %s1591_s4, 1024, %s39_s9, [#allocation6], %s1376_s27, %s1376_s27, %s1377_s28  }
  0x19   :  { %1369 = dma.done.wait [#allocation3], 1024  }
  0x1a   :  { %1370 = vsyncadd [#allocation3], 4294966272 }
  0x1b   :  { %1371 = dma.done.wait [#allocation6], 1024  }
  0x1c   :  { %1372 = vsyncadd [#allocation6], 4294966272  ;;  %v1277_v0 = vld [vmem:[%s1588_s1 + $0x38] sm:$0xff]   ;;  %v1278_v1 = vld [vmem:[%s1588_s1 + $0x30] sm:$0xff]  }
  0x1d   :  { %1141 = vmatprep.subr.bf16.mxu0 %v1277_v0  ;;  %v1279_v2 = vld [vmem:[%s1588_s1 + $0x28] sm:$0xff]   ;;  %v1280_v3 = vld [vmem:[%s1588_s1 + $0x20] sm:$0xff]   ;;  %v1281_v5 = vld [vmem:[%s1588_s1 + $0x18] sm:$0xff]  }
  0x1e   :  { %1142 = vmatpush3.bf16.msra.mxu0 %v1277_v0  ;;  %v1285_v4 = vld [vmem:[%s1587_s0] sm:$0xff]   ;;  %v1282_v6 = vld [vmem:[%s1588_s1 + $0x10] sm:$0xff]   ;;  %v1293_v7 = vld [vmem:[#allocation2 + $0x38] sm:$0xff]  }
  0x1f   :  { %1143 = vmatprep.subr.bf16.mxu0 %v1278_v1  ;;  %1157 = vmatprep.mubr.bf16.mxu0 %v1285_v4  ;;  %v1294_v8 = vld [vmem:[#allocation2 + $0x30] sm:$0xff]   ;;  %v1283_v9 = vld [vmem:[%s1588_s1 + $0x8] sm:$0xff]   ;;  %v1284_v11 = vld [vmem:[%s1588_s1] sm:$0xff]  }
  0x20   :  { %1173 = vmatprep.subr.bf16.mxu1 %v1293_v7  ;;  %v1295_v10 = vld [vmem:[#allocation2 + $0x28] sm:$0xff]   ;;  %v1296_v12 = vld [vmem:[#allocation2 + $0x20] sm:$0xff]   ;;  %v1297_v13 = vld [vmem:[#allocation2 + $0x18] sm:$0xff]  }
  0x21   :  { %1174 = vmatpush3.bf16.msra.mxu1 %v1293_v7  ;;  %v1463_v14 = vld [vmem:[%s1587_s0 + $0x8] sm:$0xff]   ;;  %v1468_v15 = vld [vmem:[%s1587_s0 + $0x10] sm:$0xff]   ;;  %v1475_v17 = vld [vmem:[%s1587_s0 + $0x18] sm:$0xff]  }
  0x22   :  { %1144 = vmatpush3.bf16.msra.mxu0 %v1278_v1  ;;  %1175 = vmatprep.subr.bf16.mxu1 %v1294_v8  ;;  %v1298_v16 = vld [vmem:[#allocation2 + $0x10] sm:$0xff]   ;;  %v1480_v18 = vld [vmem:[%s1587_s0 + $0x20] sm:$0xff]   ;;  %v1487_v19 = vld [vmem:[%s1587_s0 + $0x28] sm:$0xff]  }
  0x23   :  { %1145 = vmatprep.subr.bf16.mxu0 %v1279_v2  ;;  %v1492_v20 = vld [vmem:[%s1587_s0 + $0x30] sm:$0xff]   ;;  %v1499_v21 = vld [vmem:[%s1587_s0 + $0x38] sm:$0xff]   ;;  %v1299_v22 = vld [vmem:[#allocation2 + $0x8] sm:$0xff]  }
  0x24   :  { %v1300_v23 = vld [vmem:[#allocation2] sm:$0xff]   ;;  %v1301_v48 = vld [vmem:[#allocation5 + $0x38] sm:$0xff]   ;;  %v1302_v49 = vld [vmem:[#allocation5 + $0x30] sm:$0xff]  }
  0x25   :  { %1176 = vmatpush3.bf16.msra.mxu1 %v1294_v8  ;;  %v1303_v50 = vld [vmem:[#allocation5 + $0x28] sm:$0xff]   ;;  %v1304_v51 = vld [vmem:[#allocation5 + $0x20] sm:$0xff]   ;;  %v1305_v52 = vld [vmem:[#allocation5 + $0x18] sm:$0xff]  }
  0x26   :  { %1146 = vmatpush3.bf16.msra.mxu0 %v1279_v2  ;;  %1177 = vmatprep.subr.bf16.mxu1 %v1295_v10  ;;  %v1306_v53 = vld [vmem:[#allocation5 + $0x10] sm:$0xff]  }
  0x27   :  { %1147 = vmatprep.subr.bf16.mxu0 %v1280_v3 }
  0x29   :  { %1178 = vmatpush3.bf16.msra.mxu1 %v1295_v10 }
  0x2a   :  { %1148 = vmatpush3.bf16.msra.mxu0 %v1280_v3  ;;  %1179 = vmatprep.subr.bf16.mxu1 %v1296_v12  ;;  %v980_v3 = vld [vmem:[%s1590_s3] ss:$0 sm:$0xff] }
  0x2b   :  { %1149 = vmatprep.subr.bf16.mxu0 %v1281_v5 }
  0x2d   :  { %1180 = vmatpush3.bf16.msra.mxu1 %v1296_v12 }
  0x2e   :  { %1150 = vmatpush3.bf16.msra.mxu0 %v1281_v5  ;;  %1181 = vmatprep.subr.bf16.mxu1 %v1297_v13 }
  0x2f   :  { %1151 = vmatprep.subr.bf16.mxu0 %v1282_v6 }
  0x31   :  { %1182 = vmatpush3.bf16.msra.mxu1 %v1297_v13 }
  0x32   :  { %1152 = vmatpush3.bf16.msra.mxu0 %v1282_v6  ;;  %1183 = vmatprep.subr.bf16.mxu1 %v1298_v16 }
  0x33   :  { %1153 = vmatprep.subr.bf16.mxu0 %v1283_v9 }
  0x35   :  { %1184 = vmatpush3.bf16.msra.mxu1 %v1298_v16 }
  0x36   :  { %1154 = vmatpush3.bf16.msra.mxu0 %v1283_v9  ;;  %1185 = vmatprep.subr.bf16.mxu1 %v1299_v22 }
  0x37   :  { %1155 = vmatprep.subr.bf16.mxu0 %v1284_v11 }
  0x39   :  { %1186 = vmatpush3.bf16.msra.mxu1 %v1299_v22 }
  0x3a   :  { %1156 = vmatpush3.bf16.msra.mxu0 %v1284_v11  ;;  %1187 = vmatprep.subr.bf16.mxu1 %v1300_v23 }
  0x3d   :  { %1158 = vmatmul.mubr.bf16.vlgmr.msra.gmra.mxu0 %v1463_v14  ;;  %1188 = vmatpush3.bf16.msra.mxu1 %v1300_v23 }
  0x3e   :  { %1161 = vmatprep.mubr.bf16.mxu0 %v1468_v15  ;;  %1237 = vmatprep.subr.bf16.mxu1 %v1301_v48 }
  0x45   :  { %1162 = vmatmul.mubr.bf16.gmra.mxu0 %v1475_v17 }
  0x46   :  { %1165 = vmatprep.mubr.bf16.mxu0 %v1480_v18 }
  0x4d   :  { %1166 = vmatmul.mubr.bf16.gmra.mxu0 %v1487_v19 }
  0x4e   :  { %1169 = vmatprep.mubr.bf16.mxu0 %v1492_v20 }
  0x55   :  { %1170 = vmatmul.mubr.bf16.gmra.mxu0 %v1499_v21 }
  0x56   :  { %1221 = vmatprep.mubr.bf16.mxu0 %v1285_v4 }
  0xfd   :  { %v1159_v24 = vpop.f32.mrf.mxu0 }
  0xff   :  { %v218_v25 = vpop.f32.mrf.mxu0 }
 0x101   :  { %v1160_v26 = vpop.f32.mrf.mxu0 }
 0x102   :  { %v282_v29 = vpack.c.bf16 %v1160_v26, %v1159_v24 }
 0x103   :  { %v221_v27 = vpop.f32.mrf.mxu0 }
 0x104   :  { %v281_v28 = vpack.c.bf16 %v221_v27, %v218_v25 }
 0x105   :  { %v1163_v30 = vpop.f32.mrf.mxu0 }
 0x106   :  { %1189 = vmatprep.mubr.bf16.mxu1 %v281_v28 }
 0x107   :  { %v234_v31 = vpop.f32.mrf.mxu0  ;;  %1190 = vmatmul.mubr.bf16.vlgmr.msra.gmra.mxu1 %v282_v29 }
 0x108   :  { %1238 = vmatpush3.bf16.msra.mxu1 %v1301_v48 }
 0x109   :  { %v1164_v32 = vpop.f32.mrf.mxu0  ;;  %1239 = vmatprep.subr.bf16.mxu1 %v1302_v49 }
 0x10a   :  { %v284_v35 = vpack.c.bf16 %v1164_v32, %v1163_v30 }
 0x10b   :  { %v237_v33 = vpop.f32.mrf.mxu0 }
 0x10c   :  { %v283_v34 = vpack.c.bf16 %v237_v33, %v234_v31  ;;  %1240 = vmatpush3.bf16.msra.mxu1 %v1302_v49 }
 0x10d   :  { %v1167_v36 = vpop.f32.mrf.mxu0  ;;  %1241 = vmatprep.subr.bf16.mxu1 %v1303_v50 }
 0x10e   :  { %1193 = vmatprep.mubr.bf16.mxu1 %v283_v34 }
 0x10f   :  { %v250_v37 = vpop.f32.mrf.mxu0  ;;  %1194 = vmatmul.mubr.bf16.gmra.mxu1 %v284_v35 }
 0x110   :  { %1242 = vmatpush3.bf16.msra.mxu1 %v1303_v50 }
 0x111   :  { %v1168_v38 = vpop.f32.mrf.mxu0  ;;  %1243 = vmatprep.subr.bf16.mxu1 %v1304_v51 }
 0x112   :  { %v286_v41 = vpack.c.bf16 %v1168_v38, %v1167_v36 }
 0x113   :  { %v253_v39 = vpop.f32.mrf.mxu0 }
 0x114   :  { %v285_v40 = vpack.c.bf16 %v253_v39, %v250_v37  ;;  %1244 = vmatpush3.bf16.msra.mxu1 %v1304_v51 }
 0x115   :  { %v1171_v42 = vpop.f32.mrf.mxu0  ;;  %1245 = vmatprep.subr.bf16.mxu1 %v1305_v52 }
 0x116   :  { %1197 = vmatprep.mubr.bf16.mxu1 %v285_v40 }
 0x117   :  { %v266_v43 = vpop.f32.mrf.mxu0  ;;  %1198 = vmatmul.mubr.bf16.gmra.mxu1 %v286_v41 }
 0x118   :  { %1246 = vmatpush3.bf16.msra.mxu1 %v1305_v52 }
 0x119   :  { %v1172_v44 = vpop.f32.mrf.mxu0  ;;  %1247 = vmatprep.subr.bf16.mxu1 %v1306_v53 }
 0x11a   :  { %v288_v47 = vpack.c.bf16 %v1172_v44, %v1171_v42 }
 0x11b   :  { %v269_v45 = vpop.f32.mrf.mxu0 }
 0x11c   :  { %v287_v46 = vpack.c.bf16 %v269_v45, %v266_v43  ;;  %1248 = vmatpush3.bf16.msra.mxu1 %v1306_v53 }
 0x11e   :  { %1201 = vmatprep.mubr.bf16.mxu1 %v287_v46 }
 0x11f   :  { %1202 = vmatmul.mubr.bf16.gmra.mxu1 %v288_v47 }
 0x1c7   :  { %v1191_v54 = vpop.f32.mrf.mxu1 }
 0x1c8   :  { %v403_v43 = vadd.f32 %v1191_v54, %v980_v3  ;;  %v1307_v54 = vld [vmem:[#allocation5 + $0x8] sm:$0xff]  }
 0x1c9   :  { %v394_v55 = vpop.f32.mrf.mxu1  ;;  %1249 = vmatprep.subr.bf16.mxu1 %v1307_v54 }
 0x1ca   :  { %v459_v48 = vmax.f32 %v403_v43, 0.0  ;;  %v395_v49 = vadd.f32 %v980_v3, %v394_v55  ;;  %1250 = vmatpush3.bf16.msra.mxu1 %v1307_v54  ;;  %v1308_v55 = vld [vmem:[#allocation5] sm:$0xff]  }
 0x1cb   :  { %v1192_v56 = vpop.f32.mrf.mxu1  ;;  %1251 = vmatprep.subr.bf16.mxu1 %v1308_v55 }
 0x1cc   :  { %v406_v40 = vadd.f32 %v1192_v56, %v980_v3  ;;  %v457_v52 = vmax.f32 %v395_v49, 0.0  ;;  %v761_v56 = vld [vmem:[%s1593_s6 + $0x38] sm:$0xff] }
 0x1cd   :  { %v397_v57 = vpop.f32.mrf.mxu1 }
 0x1ce   :  { %v460_v45 = vmax.f32 %v406_v40, 0.0  ;;  %v398_v46 = vadd.f32 %v980_v3, %v397_v57  ;;  %1252 = vmatpush3.bf16.msra.mxu1 %v1308_v55  ;;  %v760_v57 = vld [vmem:[%s1593_s6 + $0x30] sm:$0xff]  ;;  %v1563_v40 = vld [vmem:[%s1592_s5] ss:$0 sm:$0xff]  ;;  %s1380_s5 = smov [#allocation7]  }
 0x1cf   :  { %v1195_v58 = vpop.f32.mrf.mxu1  ;;  %s951_s26 = sshll.u32 %s1380_s5, 4  ;;  %s952_s26 = int_to_ptr.vmem [resolvable:$true] %s951_s26 }
 0x1d0   :  { %v419_v33 = vadd.f32 %v1195_v58, %v980_v3  ;;  %v474_v50 = vpack.c.bf16 %v460_v45, %v459_v48  ;;  %v458_v51 = vmax.f32 %v398_v46, 0.0  ;;  %v763_v58 = vld [vmem:[%s1593_s6 + $0x48] sm:$0xff]  ;;  %s1349_s29 = scalar_lea.vmem %s952_s26, 1024  ;;  %p1354_p11 = scmp.lt.s32.totalorder %s952_s26, %s952_s26 }
 0x1d1   :  { %v410_v59 = vpop.f32.mrf.mxu1  ;;  %p1350_p10 = scmp.ne.s32.totalorder %s952_s26, %s1349_s29  ;;  %p1355_p12 = scmp.lt.s32.totalorder %s1349_s29, %s1349_s29 }
 0x1d2   :  { %v463_v38 = vmax.f32 %v419_v33, 0.0  ;;  %v411_v39 = vadd.f32 %v980_v3, %v410_v59  ;;  %v473_v53 = vpack.c.bf16 %v458_v51, %v457_v52  ;;  %v762_v59 = vld [vmem:[%s1593_s6 + $0x40] sm:$0xff] }
 0x1d3   :  { %v1196_v60 = vpop.f32.mrf.mxu1  ;;  %p1356_p13 = por %p1355_p12, %p1354_p11 }
 0x1d4   :  { %v422_v30 = vadd.f32 %v1196_v60, %v980_v3  ;;  %v461_v44 = vmax.f32 %v411_v39, 0.0  ;;  %v765_v60 = vld [vmem:[%s1593_s6 + $0x58] sm:$0xff] }
 0x1d5   :  { %v413_v61 = vpop.f32.mrf.mxu1  ;;  %p1357_p0 = pnand %p1356_p13, %p1350_p10 }
 0x1d6   :  { %v464_v35 = vmax.f32 %v422_v30, 0.0  ;;  %v414_v36 = vadd.f32 %v980_v3, %v413_v61  ;;  %v764_v61 = vld [vmem:[%s1593_s6 + $0x50] sm:$0xff] }
 0x1d7   :  { %v1199_v62 = vpop.f32.mrf.mxu1 }
 0x1d8   :  { %v435_v16 = vadd.f32 %v1199_v62, %v980_v3  ;;  %v476_v41 = vpack.c.bf16 %v464_v35, %v463_v38  ;;  %v462_v42 = vmax.f32 %v414_v36, 0.0  ;;  %v767_v62 = vld [vmem:[%s1593_s6 + $0x68] sm:$0xff] }
 0x1d9   :  { %v426_v63 = vpop.f32.mrf.mxu1 }
 0x1da   :  { %v467_v28 = vmax.f32 %v435_v16, 0.0  ;;  %v427_v29 = vadd.f32 %v980_v3, %v426_v63  ;;  %v475_v47 = vpack.c.bf16 %v462_v42, %v461_v44  ;;  %v766_v63 = vld [vmem:[%s1593_s6 + $0x60] sm:$0xff] }
 0x1db   :  { %v1200_v0 = vpop.f32.mrf.mxu1 }
 0x1dc   :  { %v438_v10 = vadd.f32 %v1200_v0, %v980_v3  ;;  %v465_v34 = vmax.f32 %v427_v29, 0.0  ;;  %v769_v0 = vld [vmem:[%s1593_s6 + $0x78] sm:$0xff] }
 0x1dd   :  { %v429_v1 = vpop.f32.mrf.mxu1 }
 0x1de   :  { %v468_v25 = vmax.f32 %v438_v10, 0.0  ;;  %v430_v26 = vadd.f32 %v980_v3, %v429_v1  ;;  %v768_v1 = vld [vmem:[%s1593_s6 + $0x70] sm:$0xff] }
 0x1df   :  { %v1203_v2 = vpop.f32.mrf.mxu1 }
 0x1e0   :  { %v451_v5 = vadd.f32 %v1203_v2, %v980_v3  ;;  %v478_v31 = vpack.c.bf16 %v468_v25, %v467_v28  ;;  %v466_v32 = vmax.f32 %v430_v26, 0.0 }
 0x1e1   :  { %v442_v4 = vpop.f32.mrf.mxu1 }
 0x1e2   :  { %v443_v7 = vadd.f32 %v980_v3, %v442_v4  ;;  %v471_v11 = vmax.f32 %v451_v5, 0.0  ;;  %v477_v37 = vpack.c.bf16 %v466_v32, %v465_v34 }
 0x1e3   :  { %v1204_v6 = vpop.f32.mrf.mxu1 }
 0x1e4   :  { %v454_v8 = vadd.f32 %v1204_v6, %v980_v3  ;;  %v469_v22 = vmax.f32 %v443_v7, 0.0 }
 0x1e5   :  { %v445_v9 = vpop.f32.mrf.mxu1 }
 0x1e6   :  { %v472_v12 = vmax.f32 %v454_v8, 0.0  ;;  %v446_v13 = vadd.f32 %v980_v3, %v445_v9 }
 0x1e8   :  { %v480_v23 = vpack.c.bf16 %v472_v12, %v471_v11  ;;  %v470_v24 = vmax.f32 %v446_v13, 0.0 }
 0x1ea   :  { %v479_v27 = vpack.c.bf16 %v470_v24, %v469_v22  ;;  %1205 = vmatprep.subr.bf16.mxu0 %v480_v23 }
 0x1eb   :  { %1206 = vmatpush3.bf16.msra.mxu0 %v480_v23 }
 0x1ec   :  { %1207 = vmatprep.subr.bf16.mxu0 %v479_v27 }
 0x1ef   :  { %1208 = vmatpush3.bf16.msra.mxu0 %v479_v27 }
 0x1f0   :  { %1209 = vmatprep.subr.bf16.mxu0 %v478_v31 }
 0x1f3   :  { %1210 = vmatpush3.bf16.msra.mxu0 %v478_v31 }
 0x1f4   :  { %1211 = vmatprep.subr.bf16.mxu0 %v477_v37 }
 0x1f7   :  { %1212 = vmatpush3.bf16.msra.mxu0 %v477_v37 }
 0x1f8   :  { %1213 = vmatprep.subr.bf16.mxu0 %v476_v41 }
 0x1fb   :  { %1214 = vmatpush3.bf16.msra.mxu0 %v476_v41 }
 0x1fc   :  { %1215 = vmatprep.subr.bf16.mxu0 %v475_v47 }
 0x1ff   :  { %1216 = vmatpush3.bf16.msra.mxu0 %v475_v47 }
 0x200   :  { %1217 = vmatprep.subr.bf16.mxu0 %v474_v50 }
 0x203   :  { %1218 = vmatpush3.bf16.msra.mxu0 %v474_v50 }
 0x204   :  { %1219 = vmatprep.subr.bf16.mxu0 %v473_v53 }
 0x207   :  { %1220 = vmatpush3.bf16.msra.mxu0 %v473_v53 }
 0x20a   :  { %1222 = vmatmul.mubr.bf16.vlgmr.msra.gmra.mxu0 %v1463_v14  ;;  %v756_v14 = vld [vmem:[%s1593_s6 + $0x10] sm:$0xff] }
 0x20b   :  { %1225 = vmatprep.mubr.bf16.mxu0 %v1468_v15  ;;  %v754_v15 = vld [vmem:[%s1593_s6] sm:$0xff] }
 0x212   :  { %1226 = vmatmul.mubr.bf16.gmra.mxu0 %v1475_v17  ;;  %v1379_v17 = vmov 0  }
 0x213   :  { %1229 = vmatprep.mubr.bf16.mxu0 %v1480_v18  ;;  %1276 = vset.pattern.permute.xlu1 %v1379_v17  ;;  %v757_v18 = vld [vmem:[%s1593_s6 + $0x18] sm:$0xff] }
 0x214   :  { %1275 = vset.pattern.permute.xlu0 %v1379_v17  ;;  %782 = vperm.xlu1 %1276, %v756_v14  }
 0x215   :  { %772 = vperm.xlu0 %1275, %v754_v15  }
 0x218   :  { %787 = vperm.xlu1 %1276, %v757_v18  }
 0x21a   :  { %1230 = vmatmul.mubr.bf16.gmra.mxu0 %v1487_v19  ;;  %v755_v19 = vld [vmem:[%s1593_s6 + $0x8] sm:$0xff] }
 0x21b   :  { %1233 = vmatprep.mubr.bf16.mxu0 %v1492_v20  ;;  %777 = vperm.xlu0 %1275, %v755_v19   ;;  %v759_v20 = vld [vmem:[%s1593_s6 + $0x28] sm:$0xff] }
 0x21c   :  { %797 = vperm.xlu1 %1276, %v759_v20  }
 0x220   :  { %807 = vperm.xlu1 %1276, %v761_v56  }
 0x222   :  { %1234 = vmatmul.mubr.bf16.gmra.mxu0 %v1499_v21  ;;  %v758_v21 = vld [vmem:[%s1593_s6 + $0x20] sm:$0xff] }
 0x223   :  { %792 = vperm.xlu0 %1275, %v758_v21  }
 0x224   :  { %817 = vperm.xlu1 %1276, %v763_v58  }
 0x227   :  { %802 = vperm.xlu0 %1275, %v760_v57  }
 0x228   :  { %827 = vperm.xlu1 %1276, %v765_v60  }
 0x22b   :  { %812 = vperm.xlu0 %1275, %v762_v59  }
 0x22c   :  { %837 = vperm.xlu1 %1276, %v767_v62  }
 0x22f   :  { %822 = vperm.xlu0 %1275, %v764_v61  }
 0x230   :  { %847 = vperm.xlu1 %1276, %v769_v0  }
 0x233   :  { %832 = vperm.xlu0 %1275, %v766_v63  }
 0x237   :  { %842 = vperm.xlu0 %1275, %v768_v1  }
 0x28f   :  { %v783_v33 = vpop.permute.xlu1 %782 }
 0x290   :  { %v773_v34 = vpop.permute.xlu0 %772 }
 0x293   :  { %v788_v35 = vpop.permute.xlu1 %787 }
 0x296   :  { %v778_v36 = vpop.permute.xlu0 %777 }
 0x297   :  { %v798_v37 = vpop.permute.xlu1 %797 }
 0x29b   :  { %v808_v44 = vpop.permute.xlu1 %807 }
 0x29e   :  { %v793_v38 = vpop.permute.xlu0 %792 }
 0x29f   :  { %v818_v15 = vpop.permute.xlu1 %817 }
 0x2a2   :  { %v803_v47 = vpop.permute.xlu0 %802 }
 0x2a3   :  { %v828_v62 = vpop.permute.xlu1 %827 }
 0x2a6   :  { %v813_v19 = vpop.permute.xlu0 %812 }
 0x2ca   :  { %v1223_v2 = vpop.f32.mrf.mxu0 }
 0x2cc   :  { %v515_v3 = vpop.f32.mrf.mxu0 }
 0x2ce   :  { %v1224_v4 = vpop.f32.mrf.mxu0 }
 0x2cf   :  { %v579_v7 = vpack.c.bf16 %v1224_v4, %v1223_v2  ;;  %v823_v2 = vpop.permute.xlu0 %822 }
 0x2d0   :  { %v518_v5 = vpop.f32.mrf.mxu0 }
 0x2d1   :  { %v578_v6 = vpack.c.bf16 %v518_v5, %v515_v3 }
 0x2d2   :  { %v1227_v8 = vpop.f32.mrf.mxu0 }
 0x2d3   :  { %1253 = vmatprep.mubr.bf16.mxu1 %v578_v6 }
 0x2d4   :  { %v531_v9 = vpop.f32.mrf.mxu0  ;;  %1254 = vmatmul.mubr.bf16.vlgmr.msra.gmra.mxu1 %v579_v7 }
 0x2d6   :  { %v1228_v10 = vpop.f32.mrf.mxu0 }
 0x2d7   :  { %v581_v13 = vpack.c.bf16 %v1228_v10, %v1227_v8  ;;  %v838_v10 = vpop.permute.xlu1 %837 }
 0x2d8   :  { %v534_v11 = vpop.f32.mrf.mxu0 }
 0x2d9   :  { %v580_v12 = vpack.c.bf16 %v534_v11, %v531_v9 }
 0x2da   :  { %v1231_v16 = vpop.f32.mrf.mxu0 }
 0x2db   :  { %1257 = vmatprep.mubr.bf16.mxu1 %v580_v12 }
 0x2dc   :  { %v547_v22 = vpop.f32.mrf.mxu0  ;;  %1258 = vmatmul.mubr.bf16.gmra.mxu1 %v581_v13 }
 0x2de   :  { %v1232_v23 = vpop.f32.mrf.mxu0 }
 0x2df   :  { %v583_v26 = vpack.c.bf16 %v1232_v23, %v1231_v16  ;;  %v833_v16 = vpop.permute.xlu0 %832 }
 0x2e0   :  { %v550_v24 = vpop.f32.mrf.mxu0 }
 0x2e1   :  { %v582_v25 = vpack.c.bf16 %v550_v24, %v547_v22 }
 0x2e2   :  { %v1235_v27 = vpop.f32.mrf.mxu0 }
 0x2e3   :  { %1261 = vmatprep.mubr.bf16.mxu1 %v582_v25 }
 0x2e4   :  { %v563_v28 = vpop.f32.mrf.mxu0  ;;  %1262 = vmatmul.mubr.bf16.gmra.mxu1 %v583_v26 }
 0x2e6   :  { %v1236_v29 = vpop.f32.mrf.mxu0 }
 0x2e7   :  { %v585_v32 = vpack.c.bf16 %v1236_v29, %v1235_v27 }
 0x2e8   :  { %v566_v30 = vpop.f32.mrf.mxu0 }
 0x2e9   :  { %v584_v31 = vpack.c.bf16 %v566_v30, %v563_v28  ;;  %v848_v30 = vpop.permute.xlu1 %847 }
 0x2eb   :  { %1265 = vmatprep.mubr.bf16.mxu1 %v584_v31 }
 0x2ec   :  { %1266 = vmatmul.mubr.bf16.gmra.mxu1 %v585_v32 }
 0x394   :  { %v1255_v39 = vpop.f32.mrf.mxu1 }
 0x395   :  { %v700_v42 = vadd.f32 %v1255_v39, %v1563_v40 }
 0x396   :  { %v691_v41 = vpop.f32.mrf.mxu1 }
 0x397   :  { %v692_v45 = vadd.f32 %v1563_v40, %v691_v41  ;;  %v852_v49 = vmul.f32 %v783_v33, %v700_v42  ;;  %v843_v33 = vpop.permute.xlu0 %842 }
 0x398   :  { %v1256_v43 = vpop.f32.mrf.mxu1 }
 0x399   :  { %v703_v46 = vadd.f32 %v1256_v43, %v1563_v40  ;;  %v850_v53 = vmul.f32 %v773_v34, %v692_v45 }
 0x39a   :  { %v694_v48 = vpop.f32.mrf.mxu1 }
 0x39b   :  { %v853_v50 = vmul.f32 %v788_v35, %v703_v46  ;;  %v695_v51 = vadd.f32 %v1563_v40, %v694_v48 }
 0x39c   :  { %v1259_v52 = vpop.f32.mrf.mxu1 }
 0x39d   :  { %v1038_v54 = vpack.c.bf16 %v853_v50, %v852_v49  ;;  %v851_v55 = vmul.f32 %v778_v36, %v695_v51  ;;  %v716_v18 = vadd.f32 %v1259_v52, %v1563_v40 }
 0x39e   :  { %v707_v14 = vpop.f32.mrf.mxu1 }
 0x39f   :  { %1070 = vst [vmem:[#allocation7 + $0x8] sm:$0xff] %v1038_v54   ;;  %v1033_v17 = vpack.c.bf16 %v851_v55, %v850_v53  ;;  %v708_v21 = vadd.f32 %v1563_v40, %v707_v14  ;;  %v856_v58 = vmul.f32 %v803_v47, %v716_v18 }
 0x3a0   :  { %v1260_v20 = vpop.f32.mrf.mxu1 }
 0x3a1   :  { %1034 = vst [vmem:[#allocation7] sm:$0xff] %v1033_v17   ;;  %v719_v56 = vadd.f32 %v1260_v20, %v1563_v40  ;;  %v854_v63 = vmul.f32 %v793_v38, %v708_v21 }
 0x3a2   :  { %v710_v57 = vpop.f32.mrf.mxu1 }
 0x3a3   :  { %v857_v59 = vmul.f32 %v808_v44, %v719_v56  ;;  %v711_v60 = vadd.f32 %v1563_v40, %v710_v57 }
 0x3a4   :  { %v1263_v61 = vpop.f32.mrf.mxu1 }
 0x3a5   :  { %v1048_v0 = vpack.c.bf16 %v857_v59, %v856_v58  ;;  %v855_v1 = vmul.f32 %v798_v37, %v711_v60  ;;  %v732_v5 = vadd.f32 %v1263_v61, %v1563_v40 }
 0x3a6   :  { %v723_v3 = vpop.f32.mrf.mxu1 }
 0x3a7   :  { %1072 = vst [vmem:[#allocation7 + $0x18] sm:$0xff] %v1048_v0   ;;  %v1043_v4 = vpack.c.bf16 %v855_v1, %v854_v63  ;;  %v724_v7 = vadd.f32 %v1563_v40, %v723_v3  ;;  %v860_v11 = vmul.f32 %v823_v2, %v732_v5 }
 0x3a8   :  { %v1264_v6 = vpop.f32.mrf.mxu1 }
 0x3a9   :  { %1071 = vst [vmem:[#allocation7 + $0x10] sm:$0xff] %v1043_v4   ;;  %v735_v8 = vadd.f32 %v1264_v6, %v1563_v40  ;;  %v858_v23 = vmul.f32 %v813_v19, %v724_v7 }
 0x3aa   :  { %v726_v9 = vpop.f32.mrf.mxu1 }
 0x3ab   :  { %v861_v12 = vmul.f32 %v828_v62, %v735_v8  ;;  %v727_v13 = vadd.f32 %v1563_v40, %v726_v9 }
 0x3ac   :  { %v1267_v22 = vpop.f32.mrf.mxu1 }
 0x3ad   :  { %v1058_v24 = vpack.c.bf16 %v861_v12, %v860_v11  ;;  %v859_v25 = vmul.f32 %v818_v15, %v727_v13  ;;  %v748_v28 = vadd.f32 %v1267_v22, %v1563_v40 }
 0x3ae   :  { %v739_v26 = vpop.f32.mrf.mxu1 }
 0x3af   :  { %1074 = vst [vmem:[#allocation7 + $0x28] sm:$0xff] %v1058_v24   ;;  %v1053_v27 = vpack.c.bf16 %v859_v25, %v858_v23  ;;  %v740_v31 = vadd.f32 %v1563_v40, %v739_v26  ;;  %v864_v35 = vmul.f32 %v843_v33, %v748_v28 }
 0x3b0   :  { %v1268_v29 = vpop.f32.mrf.mxu1 }
 0x3b1   :  { %1073 = vst [vmem:[#allocation7 + $0x20] sm:$0xff] %v1053_v27   ;;  %v751_v32 = vadd.f32 %v1268_v29, %v1563_v40  ;;  %v862_v38 = vmul.f32 %v833_v16, %v740_v31 }
 0x3b2   :  { %v742_v34 = vpop.f32.mrf.mxu1 }
 0x3b3   :  { %v865_v36 = vmul.f32 %v848_v30, %v751_v32  ;;  %v743_v37 = vadd.f32 %v1563_v40, %v742_v34 }
 0x3b5   :  { %v1068_v39 = vpack.c.bf16 %v865_v36, %v864_v35  ;;  %v863_v41 = vmul.f32 %v838_v10, %v743_v37 }
 0x3b7   :  { %1076 = vst [vmem:[#allocation7 + $0x38] sm:$0xff] %v1068_v39   ;;  %v1063_v42 = vpack.c.bf16 %v863_v41, %v862_v38 }
 0x3b9   :  { %1075 = vst [vmem:[#allocation7 + $0x30] sm:$0xff] %v1063_v42  }
 0x3ba   :  { %1360 = shalt.err (!%p1357_p0)
}
 0x3bb   :  { %957 = dma.vmem_to_hbm [thread:$0]  %s952_s26, 1024, %s1594_s7, [#allocation4], %s1376_s27, %s1376_s27, %s1377_s28  }
 0x3bc   :  { %1373 = dma.done.wait [#allocation4], 1024  }
 0x3bd   :  { %1374 = vsyncadd [#allocation4], 4294966272 }
 0x3be   :  { %961 = vsyncpa [#allocation3], 1 }
 0x3bf   :  { %962 = vsyncpa [#allocation6], 1 }
 0x3c0   :  { %963 = vsyncpa [#allocation4], 1 }

</bundles_post_ra>
